<compile_context>
chip_gen: v6e
topology: v6e:2x2x1
jax: 0.10.0
libtpu: 0.0.40
codegen_flags: <defaults>
</compile_context>

<pallas_src>
import jax
import jax.numpy as jnp
from jax import lax
from jax.experimental import pallas as pl
from jax.experimental.pallas import tpu as pltpu

SEQ = 32        # flat token count (Mistral-style flattened batch of seqlens)
HIDDEN = 128    # model dim  (full 128-lane vreg width)
VOCAB = 512     # vocab size (multiple of the 256-wide output tile)
TILE_M = 16     # S tile  (full bf16 sublane tile for the scratch)
TILE_N = 256    # V tile  (256-wide MXU-friendly, unmasked lane-dense stores)
RMS_EPS = 1e-5


def lm_head_kernel(x_ref, w_ref, o_ref, xn_ref):
    """Fused RMSNorm + lm_head projection for one (S-tile, V-tile) block.

    x_ref : (TILE_M, HIDDEN) f32 embedded tokens
    w_ref : (TILE_N, HIDDEN) bf16 lm_head weight tile (PyTorch (V, D) layout)
    o_ref : (TILE_M, TILE_N) f32 logits tile
    xn_ref: (TILE_M, HIDDEN) bf16 VMEM scratch holding normalized activations,
            computed once per S-tile and reused across all V-tiles.
    """
    j = pl.program_id(1)

    @pl.when(j == 0)
    def _():
        x = x_ref[...]                                   # already f32
        var = jnp.mean(x * x, axis=-1, keepdims=True)    # full-D reduction (D untiled)
        xn_ref[...] = (x * lax.rsqrt(var + RMS_EPS)).astype(jnp.bfloat16)

    # Contract on D with the weight kept in (V, D) layout; the MXU handles the
    # transposed-RHS contraction natively, so no transpose is ever materialized.
    o_ref[...] = lax.dot_general(
        xn_ref[...], w_ref[...],
        dimension_numbers=(((1,), (1,)), ((), ())),
        preferred_element_type=jnp.float32,
    )


def model_forward(input_ids, embed_table, w_out, seqlens=None, cache=None):
    """ModelBase.forward equivalent.

    input_ids : (S,)  int32 token ids
    embed_table: (VOCAB, HIDDEN) f32
    w_out     : (VOCAB, HIDDEN) bf16   (PyTorch nn.Linear weight layout, untransposed)
    returns logits: (S, VOCAB) f32
    """
    del seqlens, cache  # not used by this minimal concrete model

    # Embedding gather stays as cheap glue at these sizes.
    # TODO(synk): at realistic vocab sizes, fuse the gather into the kernel via
    #             PrefetchScalarGridSpec + pl.Element row-gather on embed_table.
    x = jnp.take(embed_table, input_ids, axis=0)          # (S, D) f32

    S, D = x.shape
    V = w_out.shape[0]

    cost = pl.CostEstimate(
        flops=2 * S * D * V + 4 * S * D,
        transcendentals=S,
        bytes_accessed=S * D * 4 + V * D * 2 + S * V * 4,
    )

    return pl.pallas_call(
        lm_head_kernel,
        out_shape=jax.ShapeDtypeStruct((S, V), jnp.float32),
        grid=(S // TILE_M, V // TILE_N),
        in_specs=[
            pl.BlockSpec((TILE_M, D), lambda i, j: (i, 0)),   # activations: per S-tile
            pl.BlockSpec((TILE_N, D), lambda i, j: (j, 0)),   # weight: per V-tile, (V, D) layout
        ],
        out_specs=pl.BlockSpec((TILE_M, TILE_N), lambda i, j: (i, j)),
        scratch_shapes=[pltpu.VMEM((TILE_M, D), jnp.bfloat16)],
        compiler_params=pltpu.CompilerParams(
            # S-tiles independent -> parallel (megacore); V axis carries the
            # hoisted-norm scratch dependency -> arbitrary (sequential).
            dimension_semantics=("parallel", "arbitrary"),
        ),
        cost_estimate=cost,
    )(x, w_out)


def _reference_forward(input_ids, embed_table, w_out):
    x = jnp.take(embed_table, input_ids, axis=0).astype(jnp.float32)
    var = jnp.mean(x * x, axis=-1, keepdims=True)
    xn = (x * lax.rsqrt(var + RMS_EPS)).astype(jnp.bfloat16)
    return jnp.dot(xn, w_out.T, preferred_element_type=jnp.float32)


if __name__ == "__main__":
    key = jax.random.PRNGKey(0)
    k_ids, k_emb, k_out = jax.random.split(key, 3)

    # Deterministic synthetic parameters (no checkpoint loading).
    input_ids = jax.random.randint(k_ids, (SEQ,), 0, VOCAB, dtype=jnp.int32)
    embed_table = jax.random.normal(k_emb, (VOCAB, HIDDEN), dtype=jnp.float32) * 0.02
    # lm_head weight stored bf16 (halves HBM traffic, MXU-native operand dtype),
    # kept in PyTorch nn.Linear (V, D) layout — no wrapper-side transpose.
    w_out = (jax.random.normal(k_out, (VOCAB, HIDDEN), dtype=jnp.float32) * 0.02
             ).astype(jnp.bfloat16)

    logits = jax.block_until_ready(model_forward(input_ids, embed_table, w_out))
    ref = jax.block_until_ready(_reference_forward(input_ids, embed_table, w_out))

    assert logits.shape == (SEQ, VOCAB)
    assert logits.dtype == jnp.float32
    assert jnp.allclose(logits, ref, atol=2e-2, rtol=2e-2), float(
        jnp.max(jnp.abs(logits - ref)))

    print("KERNEL_OK")
</pallas_src>

<mosaic_0001>
module attributes {stable_mosaic.version = 11 : i64} {
  func.func @lm_head_kernel(%arg0: i32, %arg1: i32, %arg2: memref<16x128xf32, #tpu.memory_space<vmem>>, %arg3: memref<256x128xbf16, #tpu.memory_space<vmem>>, %arg4: memref<16x256xf32, #tpu.memory_space<vmem>>, %arg5: memref<16x128xbf16, #tpu.memory_space<vmem>>) attributes {dimension_semantics = [#tpu.dimension_semantics<parallel>, #tpu.dimension_semantics<arbitrary>], iteration_bounds = array<i64: 2, 2>, scalar_prefetch = 0 : i64, scratch_operands = 1 : i64, tpu.core_type = #tpu.core_type<tc>, window_params = [{transform_indices = @transform_0, window_bounds = array<i64: 16, 128>}, {transform_indices = @transform_1, window_bounds = array<i64: 256, 128>}, {transform_indices = @transform_2, window_bounds = array<i64: 16, 256>}]} {
    %c0_i32 = arith.constant 0 : i32
    %0 = arith.cmpi eq, %arg1, %c0_i32 : i32
    %1 = arith.extui %0 : i1 to i32
    %c0_i32_0 = arith.constant 0 : i32
    %2 = arith.cmpi ne, %1, %c0_i32_0 : i32
    scf.if %2 {
      %c0_6 = arith.constant 0 : index
      %c0_7 = arith.constant 0 : index
      %7 = vector.load %arg2[%c0_6, %c0_7] : memref<16x128xf32, #tpu.memory_space<vmem>>, vector<16x128xf32>
      %8 = arith.mulf %7, %7 : vector<16x128xf32>
      %cst_8 = arith.constant dense<0.000000e+00> : vector<16xf32>
      %9 = vector.multi_reduction <add>, %8, %cst_8 [1] : vector<16x128xf32> to vector<16xf32>
      %10 = vector.shape_cast %9 : vector<16xf32> to vector<16x1xf32>
      %cst_9 = arith.constant 1.280000e+02 : f32
      %11 = vector.broadcast %cst_9 : f32 to vector<16x1xf32>
      %12 = arith.divf %10, %11 : vector<16x1xf32>
      %cst_10 = arith.constant 9.99999974E-6 : f32
      %13 = vector.broadcast %cst_10 : f32 to vector<16x1xf32>
      %14 = arith.addf %12, %13 : vector<16x1xf32>
      %15 = math.rsqrt %14 : vector<16x1xf32>
      %16 = vector.broadcast %15 : vector<16x1xf32> to vector<16x128xf32>
      %17 = arith.mulf %7, %16 : vector<16x128xf32>
      %18 = arith.truncf %17 : vector<16x128xf32> to vector<16x128xbf16>
      %c0_11 = arith.constant 0 : index
      %c0_12 = arith.constant 0 : index
      %19 = vector.load %arg5[%c0_11, %c0_12] : memref<16x128xbf16, #tpu.memory_space<vmem>>, vector<16x128xbf16>
      tpu.vector_store %arg5[%c0_11, %c0_12], %18 {strides = array<i32>} : memref<16x128xbf16, #tpu.memory_space<vmem>>, vector<16x128xbf16>,
    } else {
    }
    %c0 = arith.constant 0 : index
    %c0_1 = arith.constant 0 : index
    %3 = vector.load %arg5[%c0, %c0_1] : memref<16x128xbf16, #tpu.memory_space<vmem>>, vector<16x128xbf16>
    %c0_2 = arith.constant 0 : index
    %c0_3 = arith.constant 0 : index
    %4 = vector.load %arg3[%c0_2, %c0_3] : memref<256x128xbf16, #tpu.memory_space<vmem>>, vector<256x128xbf16>
    %cst = arith.constant dense<0.000000e+00> : vector<16x256xf32>
    %5 = tpu.matmul %3, %4, %cst {dimension_numbers = #tpu.dot_dimension_numbers<[1], [1], [0], [0], [0, 0, 1, 0], [], []>} : vector<16x128xbf16>, vector<256x128xbf16>, vector<16x256xf32> -> vector<16x256xf32>
    %c0_4 = arith.constant 0 : index
    %c0_5 = arith.constant 0 : index
    %6 = vector.load %arg4[%c0_4, %c0_5] : memref<16x256xf32, #tpu.memory_space<vmem>>, vector<16x256xf32>
    tpu.vector_store %arg4[%c0_4, %c0_5], %5 {strides = array<i32>} : memref<16x256xf32, #tpu.memory_space<vmem>>, vector<16x256xf32>,
    return
  }
  func.func @transform_0(%arg0: i32, %arg1: i32) -> (i32, i32) {
    %c0_i32 = arith.constant 0 : i32
    %c0_i32_0 = arith.constant 0 : i32
    return %arg0, %c0_i32 : i32, i32
  }
  func.func @transform_1(%arg0: i32, %arg1: i32) -> (i32, i32) {
    %c0_i32 = arith.constant 0 : i32
    %c0_i32_0 = arith.constant 0 : i32
    return %arg1, %c0_i32 : i32, i32
  }
  func.func @transform_2(%arg0: i32, %arg1: i32) -> (i32, i32) {
    %c0_i32 = arith.constant 0 : i32
    return %arg0, %arg1 : i32, i32
  }
}

</mosaic_0001>

<bundles_post_ra>
// kernel: tpu_custom_call.1
= control target key start
LH: loop header
LB: loop body
LE: loop exit
PB: predicated region body
PF: predicated region fallthrough
CT: control target
= control target key end

     0   :  { %s1334_s0 = inlined_call_operand.hbm [shape: f32[32,128], index: 0, kind: input, shape index: {}]   ;;  %s1335_s1 = inlined_call_operand.hbm [shape: bf16[512,128], index: 1, kind: input, shape index: {}]   ;;  %s1336_s2 = inlined_call_operand.hbm [shape: f32[32,512], index: 2, kind: output, shape index: {}]  }
   0x1   :  { %1344 = sst [smem:[#allocation18_spill]] %s1334_s0 }
   0x2   :  { %1345 = sst [smem:[#allocation19_spill]] %s1336_s2 }
   0x3   :  { %7 = vsyncpa [#allocation4], 0 }
   0x4   :  { %9 = vsyncpa [#allocation4 + $0x1], 0 }
   0x5   :  { %10 = vsyncpa [#allocation7], 0 }
   0x6   :  { %12 = vsyncpa [#allocation7 + $0x1], 0 }
   0x7   :  { %13 = vsyncpa [#allocation5], 0 }
   0x8   :  { %15 = vsyncpa [#allocation5 + $0x1], 0  ;;  %s1021_s9 = smov 0   ;;  %s1023_s10 = smov 0  }
   0x9   :  { %s1025_s11 = smov 0   ;;  %s1027_s12 = smov 0  }
   0xa   :  { %s1029_s13 = smov 0   ;;  %s1031_s14 = smov 0  }
   0xb   :  { %s1033_s15 = smov 0   ;;  %s1035_s16 = smov 0  }
   0xc   :  { %s1037_s17 = smov 0   ;;  %s1039_s18 = smov 0  }
   0xd   :  { %s1041_s19 = smov 0   ;;  %s1043_s20 = smov 0  }
   0xe   :  { %s1045_s21 = smov 0   ;;  %s1047_s22 = smov 0  }
   0xf LB: > { %1346 = sst [smem:[#allocation12_spill]] %s982_s19  ;;  %s562_s23 = sadd.s32 4294967295, %s994_s22   ;;  %s994_s22 = sphi %s1047_s22, %s21_s22   ;;  %s990_s21 = sphi %s1045_s21, %s1374_s21   ;;  %s986_s20 = sphi %s1043_s20, %s1386_s20   ;;  %s982_s19 = sphi %s1041_s19, %s1372_s19   ;;  %s978_s18 = sphi %s1039_s18, %s1385_s18   ;;  %s974_s17 = sphi %s1037_s17, %s1384_s17   ;;  %s970_s16 = sphi %s1035_s16, %s1383_s16   ;;  %s966_s15 = sphi %s1033_s15, %s1382_s15   ;;  %s962_s14 = sphi %s1031_s14, %s1381_s14   ;;  %s958_s13 = sphi %s1029_s13, %s1380_s13   ;;  %s954_s12 = sphi %s1027_s12, %s1379_s12   ;;  %s950_s11 = sphi %s1025_s11, %s1378_s11   ;;  %s946_s10 = sphi %s1023_s10, %s1377_s10   ;;  %s942_s9 = sphi %s1021_s9, %s1376_s9  }
  0x10   : > { %1347 = sst [smem:[#allocation13_spill]] %s990_s21  ;;  %p47_p0 = scmp.ne.s32.totalorder %s974_s17, %s970_s16 }
  0x11   : > { %p48_p1 = scmp.eq.s32.totalorder %s994_s22, 0  ;;  %p53_p2 = scmp.ne.s32.totalorder %s970_s16, %s966_s15 }
  0x12   : > { %p1096_p3 = scmp.eq.s32.totalorder %s562_s23, 0  ;;  %p1100_p4 = scmp.eq.s32.totalorder %s562_s23, 3 }
  0x13   : > { %p49_p5 = por %p48_p1, %p47_p0  ;;  %p648_p7 = scmp.lt.s32.totalorder %s994_s22, 4 }
  0x14   : > { %p1108_p6 = por %p1096_p3, %p53_p2  ;;  %s131_s29 = sand.u32 1, %s974_s17  }
  0x15   : > { %s603_s30 = sshll.u32 %s990_s21, 8  ;;  %s566_s3 = sshll.u32 %s131_s29, 4 }
  0x16   : > { %s1351_s0 = sld [smem:[#allocation18_spill]]  ;;  %s135_s7 = scalar_lea.vmem [#allocation3], %s566_s3 }
  0x17   : > { %s142_s8 = sshll.u32 %s135_s7, 4  ;;  %p1120_p8 = pnand %p648_p7, %p49_p5  ;;  %s143_s8 = int_to_ptr.vmem [resolvable:$true] %s142_s8 }
  0x18   : > { %s132_s23 = scalar_lea.sflag [#allocation4], %s131_s29  ;;  %s803_s25 = scalar_lea.vmem %s143_s8, 256 }
  0x19   : > { %p792_p9 = pneg %p1120_p8  ;;  %p804_p10 = scmp.ne.s32.totalorder %s143_s8, %s803_s25 }
  0x1a   : > { %s996_s24 = smov [#allocation3]  }
  0x1b   : > { %p806_p11 = pnand %p804_p10, %p792_p9  ;;  %s808_s2 = sshll.u32 %s996_s24, 4  ;;  %s809_s2 = int_to_ptr.vmem [resolvable:$false] %s808_s2 }
  0x1c   : > { %s141_s6 = scalar_lea.hbm %s1351_s0, %s603_s30  ;;  %s810_s30 = scalar_lea.vmem %s809_s2, 512 }
  0x1d   : > { %p807_p12 = pneg %p806_p11  ;;  %p811_p13 = scmp.lt.s32.totalorder %s143_s8, %s809_s2 }
  0x1e   : > { %p812_p0 = scmp.lt.s32.totalorder %s810_s30, %s803_s25 }
  0x20   : > { %p813_p2 = por %p812_p0, %p811_p13 }
  0x22   : > { %p814_p5 = pnand %p813_p2, %p807_p12 }
  0x24   : > { %817 = shalt.err (!%p814_p5)
}
  0x25   : > { %s997_s3 = smov 128   ;;  %s998_s2 = smov 8  }
  0x26   : > { %640 = dma.hbm_to_vmem [thread:$0]  (!%p1120_p8), %s141_s6, 256, %s143_s8, %s132_s23, %s997_s3, %s997_s3, %s998_s2  }
  0x27   : > { %p572_p9 = scmp.ge.s32.totalorder %s994_s22, 1  ;;  %p171_p10 = scmp.lt.s32.totalorder %s994_s22, 5 }
  0x28   : > { %s563_s25 = sadd.s32 4294967294, %s994_s22   ;;  %s30_s29 = sadd.s32 1, %s986_s20 }
  0x29   : > { %p1130_p11 = pnand %p572_p9, %p171_p10  ;;  %s66_s4 = sadd.s32 1, %s962_s14 }
  0x2a   : > { %p31_p12 = scmp.ge.s32.totalorder %s30_s29, 2  ;;  %p73_p13 = scmp.ne.s32.totalorder %s962_s14, %s958_s13 }
  0x2b   : > { %p79_p0 = scmp.ne.s32.totalorder %s958_s13, %s954_s12  ;;  %s94_s5 = sadd.s32 1, %s950_s11 }
  0x2c   : > { %s1388_s29 = smov (%p31_p12, %s30_s29), 0  ;;  %s1355_s6 = sadd.s32 1, %s990_s21 }
  0x2d   : > { %1354 = sst [smem:[#allocation14_spill]] %s1388_s29  ;;  %s1390_s6 = smov (!%p31_p12, %s1355_s6), %s990_s21 }
  0x2e   : > { %s63_s7 = ssub.s32 %s986_s20, %s1388_s29  ;;  %p1151_p8 = por %p73_p13, %p48_p1 }
  0x2f   : > { %p35_p2 = scmp.ge.s32.totalorder %s1390_s6, 2  ;;  %p64_p5 = scmp.eq.s32.totalorder %s63_s7, 0 }
  0x30   : > { %p1157_p9 = por %p79_p0, %p1096_p3  ;;  %p104_p10 = scmp.ne.s32.totalorder %s950_s11, %s946_s10 }
  0x31   : > { %s1392_s6 = smov (%p35_p2, %s1390_s6), 0  ;;  %p110_p13 = scmp.ne.s32.totalorder %s946_s10, %s942_s9 }
  0x32   : > { %1358 = sst [smem:[#allocation15_spill]] %s1392_s6  ;;  %s37_s23 = ssub.s32 %s990_s21, %s1392_s6 }
  0x33   : > { %s1166_s15 = scalar_select %p64_p5, %s962_s14, %s66_s4  }
  0x34   : > { %p1172_p1 = por %p1100_p4, %p104_p10  ;;  %p38_p12 = scmp.eq.s32.totalorder %s37_s23, 0 }
  0x35   : > { %1359 = sst [smem:[#allocation16_spill]] %s1166_s15  ;;  %s91_s26 = sor.u32 %s63_s7, %s37_s23 }
  0x36   : > { %s1360_s30 = scalar_select %p1172_p1, 1, 0 }
  0x37   : > { %p92_p3 = scmp.eq.s32.totalorder %s91_s26, 0  ;;  %s1362_s3 = sadd.s32 1, %s974_s17 }
  0x38   : > { %1361 = sst [smem:[#allocation17_spill]] %s1360_s30  ;;  %p111_p0 = scmp.eq.s32.totalorder %s563_s25, 3 }
  0x39   : > { %s1181_s2 = scalar_select %p38_p12, %s974_s17, %s1362_s3  }
  0x3a   : > { %s1184_s0 = scalar_select %p92_p3, %s950_s11, %s94_s5  }
  0x3b   : > { %s152_s4 = sand.u32 1, %s962_s14   ;;  %p1187_p2 = por %p111_p0, %p110_p13 }
  0x3c   : > { %s569_s29 = sshll.u32 %s152_s4, 7  ;;  %s604_s6 = sshll.u32 %s986_s20, 11 }
  0x3d   : > { %s1363_s27 = scalar_select %p1187_p2, 1, 0 }
  0x3e   : > { %s156_s21 = scalar_lea.vmem [#allocation6], %s569_s29  ;;  %s162_s7 = scalar_lea.hbm %s1335_s1, %s604_s6 }
  0x3f   : > { %s163_s15 = sshll.u32 %s156_s21, 4  ;;  %p1199_p4 = pnand %p648_p7, %p1151_p8  ;;  %s164_s15 = int_to_ptr.vmem [resolvable:$true] %s163_s15 }
  0x40   : > { %s153_s25 = scalar_lea.sflag [#allocation7], %s152_s4  ;;  %s831_s23 = scalar_lea.vmem %s164_s15, 2048 }
  0x41   : > { %p820_p5 = pneg %p1199_p4  ;;  %p832_p10 = scmp.ne.s32.totalorder %s164_s15, %s831_s23 }
  0x42   : > { %s999_s21 = smov [#allocation6]  }
  0x43   : > { %p834_p12 = pnand %p832_p10, %p820_p5  ;;  %s836_s29 = sshll.u32 %s999_s21, 4  ;;  %s837_s29 = int_to_ptr.vmem [resolvable:$false] %s836_s29 }
  0x44   : > { %s838_s19 = scalar_lea.vmem %s837_s29, 4096  ;;  %p839_p13 = scmp.lt.s32.totalorder %s164_s15, %s837_s29 }
  0x45   : > { %p835_p3 = pneg %p834_p12  ;;  %p840_p0 = scmp.lt.s32.totalorder %s838_s19, %s831_s23 }
  0x47   : > { %p841_p2 = por %p840_p0, %p839_p13 }
  0x49   : > { %p842_p1 = pnand %p841_p2, %p835_p3 }
  0x4b   : > { %845 = shalt.err (!%p842_p1)
}
  0x4c   : > { %s1000_s6 = smov 64   ;;  %s1001_s8 = smov 4  }
  0x4d   : > { %643 = dma.hbm_to_vmem [thread:$0]  (!%p1199_p4), %s162_s7, 2048, %s164_s15, %s153_s25, %s1000_s6, %s1000_s6, %s1001_s8  }
  0x4e   : > { %175 = sbr.rel (%p1130_p11) target bundleno = 542 (0x21e), region = 28  ;;  %s177_s30 = sand.u32 (!%p1130_p11), 1, %s970_s16  }
  0x4f   : > { %s573_s26 = sshll.u32 (!%p1130_p11), %s177_s30, 4  ;;  %s178_s3 = scalar_lea.sflag (!%p1130_p11), [#allocation4], %s177_s30 }
  0x50   : > { %s181_s4 = scalar_lea.vmem (!%p1130_p11), [#allocation3], %s573_s26 }
  0x53   : > { %929 = dma.done.wait (%p1108_p6), %s178_s3, 256  }
  0x54   : > { %931 = vsyncadd (%p1108_p6), %s178_s3, 4294967040  ;;  %s186_s23 = sand.u32 1, %s958_s13  }
  0x55   : > { %s574_s21 = sshll.u32 %s186_s23, 7  ;;  %s187_s5 = scalar_lea.sflag [#allocation7], %s186_s23 }
  0x56   : > { %s1215_s15 = scalar_lea.vmem [#allocation6], %s574_s21 }
  0x57   : > { %933 = dma.done.wait (%p1157_p9), %s187_s5, 2048  }
  0x58   : > { %935 = vsyncadd (%p1157_p9), %s187_s5, 4294965248  ;;  %s213_s24 = sand.u32 1, %s946_s10   ;;  %p576_p6 = scmp.ne.s32.totalorder %s978_s18, 0 }
  0x59   : > { %s575_s7 = sshll.u32 %s213_s24, 5 }
  0x5a   : > { %s1224_s25 = scalar_lea.vmem [#allocation8], %s575_s7  ;;  %224 = sbr.rel (%p576_p6) target bundleno = 263 (0x107), region = 40 }
  0x5f   : > { %v225_v0 = vld [vmem:[%s181_s4] sm:$0xff]  ;;  %v226_v1 = vld [vmem:[%s181_s4 + $0x8] sm:$0xff] }
  0x60   : > { %v227_v2 = vmul.f32 %v225_v0, %v225_v0  ;;  %v228_v3 = vmul.f32 %v226_v1, %v226_v1 }
  0x62   : > { %229 = vadd.xlane.f32.xlu0 %v227_v2 }
  0x66   : > { %231 = vadd.xlane.f32.xlu0 %v228_v3 }
  0xeb   : > { %v230_v4 = vpop.xlane.xlu0 %229 }
  0xec   : > { %v234_v5 = vmul.f32 0.0078125, %v230_v4 }
  0xee   : > { %v236_v6 = vadd.f32 1e-05, %v234_v5 }
  0xef   : > { %v232_v7 = vpop.xlane.xlu0 %231 }
  0xf0   : > { %v235_v8 = vmul.f32 0.0078125, %v232_v7  ;;  %769 = vrsqrt.f32 %v236_v6 }
  0xf2   : > { %v237_v9 = vadd.f32 1e-05, %v235_v8 }
  0xf4   : > { %771 = vrsqrt.f32 %v237_v9 }
  0xfd   : > { %v770_v10 = vpop.eup %769 }
  0xfe   : > { %v240_v12 = vmul.f32 %v770_v10, %v225_v0 }
 0x101   : > { %v772_v11 = vpop.eup %771 }
 0x102   : > { %v241_v13 = vmul.f32 %v772_v11, %v226_v1 }
 0x104   : > { %v611_v14 = vpack.c.bf16 %v241_v13, %v240_v12 }
 0x106   : > { %612 = vst [vmem:[#allocation2] sm:$0xff] %v611_v14  }
 0x107 PF: > { %v773_v15 = vld [vmem:[%s1215_s15 + $0x78] sm:$0xff]   ;;  %v775_v17 = vld [vmem:[%s1215_s15 + $0x70] sm:$0xff]   ;;  %v777_v19 = vld [vmem:[%s1215_s15 + $0x68] sm:$0xff]   ;;  %s1365_s28 = sld [smem:[#allocation12_spill]]  ;;  %s598_s12 = sshll.u32 %s978_s18, 1 }
 0x108   : > { %v774_v16 = vld [vmem:[%s1215_s15 + $0x38] sm:$0xff]   ;;  %613 = vmatprep.subr.bf16.mxu0 %v773_v15  ;;  %v776_v18 = vld [vmem:[%s1215_s15 + $0x30] sm:$0xff]   ;;  %v778_v20 = vld [vmem:[%s1215_s15 + $0x28] sm:$0xff]   ;;  %s1366_s6 = sld [smem:[#allocation17_spill]]  ;;  %s452_s30 = sshll.u32 %s1224_s25, 4  ;;  %s1253_s30 = int_to_ptr.vmem [resolvable:$true] %s452_s30 }
 0x109   : > { %614 = vmatpush3.bf16.xpose.msra.mxu0 %v774_v16  ;;  %v779_v21 = vld [vmem:[%s1215_s15 + $0x60] sm:$0xff]   ;;  %v781_v24 = vld [vmem:[%s1215_s15 + $0x58] sm:$0xff]   ;;  %v783_v26 = vld [vmem:[%s1215_s15 + $0x50] sm:$0xff]   ;;  %s1367_s4 = sld [smem:[#allocation19_spill]]  ;;  %s1259_s18 = scalar_lea.sflag [#allocation5], %s213_s24 }
 0x10a   : > { %615 = vmatprep.subr.bf16.mxu0 %v775_v17  ;;  %v780_v23 = vld [vmem:[%s1215_s15 + $0x20] sm:$0xff]   ;;  %v782_v25 = vld [vmem:[%s1215_s15 + $0x18] sm:$0xff]   ;;  %v784_v27 = vld [vmem:[%s1215_s15 + $0x10] sm:$0xff]   ;;  %s846_s21 = scalar_lea.vmem %s1253_s30, 512  ;;  %s1002_s5 = smov [#allocation8]  }
 0x10b   : > { %v785_v28 = vld [vmem:[%s1215_s15 + $0x48] sm:$0xff]   ;;  %v787_v30 = vld [vmem:[%s1215_s15 + $0x40] sm:$0xff]   ;;  %p847_p7 = scmp.ne.s32.totalorder %s1253_s30, %s846_s21 }
 0x10c   : > { %v786_v29 = vld [vmem:[%s1215_s15 + $0x8] sm:$0xff]   ;;  %v788_v31 = vld [vmem:[%s1215_s15] sm:$0xff]   ;;  %s850_s15 = sshll.u32 %s1002_s5, 4  ;;  %s851_s15 = int_to_ptr.vmem [resolvable:$false] %s850_s15 }
 0x10d   : > { %v789_v22 = vld [vmem:[#allocation2] sm:$0xff]   ;;  %s607_s29 = sshll.u32 %s1365_s28, 3  ;;  %s852_s7 = scalar_lea.vmem %s851_s15, 1024 }
 0x10e   : > { %629 = vmatprep.mubr.bf16.mxu0 %v789_v22  ;;  %s449_s19 = sadd.s32 %s607_s29, %s598_s12  ;;  %p1368_p11 = scmp.ne.s32.totalorder %s1366_s6, 0 }
 0x10f   : > { %s600_s8 = sshll.u32 %s449_s19, 7  ;;  %p853_p1 = scmp.lt.s32.totalorder %s1253_s30, %s851_s15 }
 0x110   : > { %s1251_s23 = scalar_lea.hbm %s1367_s4, %s600_s8  ;;  %p848_p8 = pnand %p847_p7, %p1368_p11 }
 0x111   : > { %616 = vmatpush3.bf16.xpose.msra.mxu0 %v776_v18  ;;  %p854_p2 = scmp.lt.s32.totalorder %s852_s7, %s846_s21 }
 0x112   : > { %617 = vmatprep.subr.bf16.mxu0 %v777_v19  ;;  %p849_p9 = pneg %p848_p8 }
 0x113   : > { %p855_p4 = por %p854_p2, %p853_p1 }
 0x115   : > { %p856_p5 = pnand %p855_p4, %p849_p9 }
 0x119   : > { %618 = vmatpush3.bf16.xpose.msra.mxu0 %v778_v20 }
 0x11a   : > { %619 = vmatprep.subr.bf16.mxu0 %v779_v21 }
 0x121   : > { %620 = vmatpush3.bf16.xpose.msra.mxu0 %v780_v23 }
 0x122   : > { %621 = vmatprep.subr.bf16.mxu0 %v781_v24 }
 0x129   : > { %622 = vmatpush3.bf16.xpose.msra.mxu0 %v782_v25 }
 0x12a   : > { %623 = vmatprep.subr.bf16.mxu0 %v783_v26 }
 0x131   : > { %624 = vmatpush3.bf16.xpose.msra.mxu0 %v784_v27 }
 0x132   : > { %625 = vmatprep.subr.bf16.mxu0 %v785_v28 }
 0x139   : > { %626 = vmatpush3.bf16.xpose.msra.mxu0 %v786_v29 }
 0x13a   : > { %627 = vmatprep.subr.bf16.mxu0 %v787_v30 }
 0x141   : > { %628 = vmatpush3.bf16.xpose.msra.mxu0 %v788_v31 }
 0x148   : > { %630 = vmatmul.mubr.bf16.vlgmr.msra.gmra.mxu0 %v789_v22 }
 0x208   : > { %v422_v32 = vpop.f32.mrf.mxu0 }
 0x209   : > { %431 = vst [vmem:[%s1224_s25] sm:$0xff] %v422_v32 }
 0x20a   : > { %v424_v33 = vpop.f32.mrf.mxu0 }
 0x20b   : > { %432 = vst [vmem:[%s1224_s25 + $0x8] sm:$0xff] %v424_v33 }
 0x20c   : > { %v426_v34 = vpop.f32.mrf.mxu0 }
 0x20d   : > { %433 = vst [vmem:[%s1224_s25 + $0x10] sm:$0xff] %v426_v34 }
 0x20e   : > { %v428_v35 = vpop.f32.mrf.mxu0 }
 0x20f   : > { %434 = vst [vmem:[%s1224_s25 + $0x18] sm:$0xff] %v428_v35 }
 0x210   : > { %859 = shalt.err (!%p856_p5)
}
 0x211   : > { %s860_s24 = scalar_lea.hbm %s1251_s23, 512  ;;  %s864_s12 = scalar_lea.hbm %s1367_s4, 2048 }
 0x212   : > { %p861_p10 = scmp.ne.s32.totalorder %s1251_s23, %s860_s24  ;;  %p865_p13 = scmp.lt.s32.totalorder %s1251_s23, %s1367_s4 }
 0x213   : > { %p866_p0 = scmp.lt.s32.totalorder %s864_s12, %s860_s24 }
 0x214   : > { %p862_p12 = pnand %p861_p10, %p1368_p11 }
 0x215   : > { %p867_p6 = por %p866_p0, %p865_p13 }
 0x216   : > { %p863_p3 = pneg %p862_p12 }
 0x218   : > { %p868_p7 = pnand %p867_p6, %p863_p3 }
 0x21a   : > { %871 = shalt.err (!%p868_p7)
}
 0x21b   : > { %s1003_s8 = smov 256   ;;  %s1004_s26 = smov 512  }
 0x21c   : > { %s1005_s3 = smov 16  }
 0x21d   : > { %635 = dma.vmem_to_hbm [thread:$0]  (%p1368_p11), %s1253_s30, 512, %s1251_s23, %s1259_s18, %s1003_s8, %s1004_s26, %s1005_s3  }
 0x21e PF: > { %p649_p8 = scmp.ge.s32.totalorder %s994_s22, 2  ;;  %s467_s21 = sand.u32 1, %s942_s9  }
 0x21f   : > { %p1369_p9 = scmp.ne.s32.totalorder %s1363_s27, 0  ;;  %s468_s5 = scalar_lea.sflag [#allocation5], %s467_s21 }
 0x221   : > { %p645_p1 = pnand %p649_p8, %p1369_p9 }
 0x223   : > { %p646_p2 = pneg %p645_p1 }
 0x225   : > { %937 = dma.done.wait (%p646_p2), %s468_s5, 512  }
 0x226   : > { %939 = vsyncadd (%p646_p2), %s468_s5, 4294966784  ;;  %s21_s22 = sadd.s32 1, %s994_s22   ;;  %s1371_s6 = sld [smem:[#allocation16_spill]] }
 0x227   : > { %p1287_p4 = scmp.ge.s32.totalorder %s21_s22, 6   ;;  %s1372_s19 = sld [smem:[#allocation13_spill]] }
 0x228   : > { %s1373_s27 = sld [smem:[#allocation14_spill]]  ;;  %s1376_s9 = smov %s946_s10 }
 0x229   : > { %s1374_s21 = sld [smem:[#allocation15_spill]]  ;;  %s1377_s10 = smov %s950_s11 }
 0x22a   : > { %s1378_s11 = smov %s1184_s0  ;;  %s1379_s12 = smov %s958_s13 }
 0x22b   : > { %s1380_s13 = smov %s962_s14  ;;  %s1382_s15 = smov %s970_s16 }
 0x22c   : > { %s1381_s14 = smov %s1371_s6  ;;  %s1383_s16 = smov %s974_s17 }
 0x22d   : > { %s1384_s17 = smov %s1181_s2  ;;  %s1385_s18 = smov %s986_s20 }
 0x22e   : > { %s1386_s20 = smov %s1373_s27  ;;  %20 = sbr.rel (!%p1287_p4) target bundleno = 15 (0xf), region = 90 }
 0x233   :  { %473 = vsyncpa [#allocation4], 1 }
 0x234   :  { %475 = vsyncpa [#allocation4 + $0x1], 1 }
 0x235   :  { %476 = vsyncpa [#allocation7], 1 }
 0x236   :  { %478 = vsyncpa [#allocation7 + $0x1], 1 }
 0x237   :  { %479 = vsyncpa [#allocation5], 1 }
 0x238   :  { %481 = vsyncpa [#allocation5 + $0x1], 1 }

</bundles_post_ra>
